<compile_context>
chip_gen: v7x
topology: tpu7x:2x2x1
jax: 0.10.0
libtpu: 0.0.40
codegen_flags: <defaults>
</compile_context>

<pallas_src>
import functools

import jax
import jax.numpy as jnp
from jax.experimental import pallas as pl
from jax.experimental.pallas import tpu as pltpu

LANES = 128
EPS = 1e-7


def _round_up(x, m):
    return ((x + m - 1) // m) * m


def _cox_ph_kernel(tri_lane_ref, tri_row_ref, logh_ref, ev_ref, out_ref,
                   gamma_ref, carry_ref, num_ref, den_ref, *, n, tile_r):
    p = pl.program_id(0)          # phase: 0 = global max, 1 = scan + loss
    t = pl.program_id(1)          # row-tile index
    n_tiles = pl.num_programs(1)

    # Global flat index of every element of this tile (row-major layout).
    row_ids = jax.lax.broadcasted_iota(jnp.int32, (tile_r, LANES), 0)
    col_ids = jax.lax.broadcasted_iota(jnp.int32, (tile_r, LANES), 1)
    flat_idx = (t * tile_r + row_ids) * LANES + col_ids
    valid = flat_idx < n

    log_h = logh_ref[...]

    # ---------------- phase 0: gamma = max(log_h) over valid lanes ----------
    @pl.when((p == 0) & (t == 0))
    def _():
        gamma_ref[...] = jnp.full_like(gamma_ref, -jnp.inf)

    @pl.when(p == 0)
    def _():
        tile_max = jnp.max(jnp.where(valid, log_h, -jnp.inf))
        gamma_ref[...] = jnp.maximum(gamma_ref[...], tile_max)

    # ---------------- phase 1: blocked cumsum + loss accumulation -----------
    @pl.when((p == 1) & (t == 0))
    def _():
        carry_ref[...] = jnp.zeros_like(carry_ref)
        num_ref[...] = jnp.zeros_like(num_ref)
        den_ref[...] = jnp.zeros_like(den_ref)

    @pl.when(p == 1)
    def _():
        gamma = gamma_ref[...]                      # (1, 1)
        events = ev_ref[...]                        # (tile_r, 128), zero-padded

        # exp(log_h - gamma); padded lanes get exp(-1e30) == 0 exactly
        # (mask the exponent argument, not the result).
        ex = jnp.exp(jnp.where(valid, log_h - gamma, -1e30))

        # Intra-row inclusive cumsum on the MXU with the constant 128x128 tri.
        row_cumsum = jnp.dot(ex, tri_lane_ref[...],
                             preferred_element_type=jnp.float32)
        row_sums = row_cumsum[:, LANES - 1:LANES]   # (tile_r, 1)

        # Exclusive prefix over the rows of this tile (strictly-lower tri).
        row_prefix = jnp.dot(tri_row_ref[...], row_sums,
                             preferred_element_type=jnp.float32)

        # Inclusive cumsum in flattened order, including all earlier tiles.
        csum = carry_ref[...] + row_prefix + row_cumsum

        log_cumsum_h = jnp.log(csum + EPS) + gamma

        # Padded events are zero, so padded lanes contribute nothing.
        num_ref[...] += jnp.sum((log_h - log_cumsum_h) * events)
        den_ref[...] += jnp.sum(events)
        carry_ref[...] += jnp.sum(ex)

    @pl.when((p == 1) & (t == n_tiles - 1))
    def _():
        loss = -num_ref[...]
        den = den_ref[...]
        # PyTorch: if events.sum() == 0 return loss, else loss / events.sum()
        out_ref[...] = jnp.where(den == 0.0, loss, loss / den)


def cox_ph_loss_sorted_pallas(log_h, events, *, max_tile_rows=512):
    log_h = jnp.reshape(log_h, (-1,)).astype(jnp.float32)
    events = jnp.reshape(events, (-1,)).astype(jnp.float32)
    n = log_h.shape[0]

    rows = max(1, (n + LANES - 1) // LANES)
    tile_r = min(max_tile_rows, _round_up(rows, 8))
    rows_pad = _round_up(rows, tile_r)
    n_tiles = rows_pad // tile_r

    pad = rows_pad * LANES - n
    logh_p = jnp.pad(log_h, (0, pad)).reshape(rows_pad, LANES)
    ev_p = jnp.pad(events, (0, pad)).reshape(rows_pad, LANES)

    # Constant scan matrices, built once on host and kept resident in VMEM.
    tri_lane = jnp.triu(jnp.ones((LANES, LANES), jnp.float32))        # j <= c
    tri_row = jnp.tril(jnp.ones((tile_r, tile_r), jnp.float32), -1)   # j <  i

    kernel = functools.partial(_cox_ph_kernel, n=n, tile_r=tile_r)

    out = pl.pallas_call(
        kernel,
        out_shape=jax.ShapeDtypeStruct((1, 1), jnp.float32),
        grid_spec=pltpu.PrefetchScalarGridSpec(
            num_scalar_prefetch=0,
            grid=(2, n_tiles),            # (phase, row-tile)
            in_specs=[
                pl.BlockSpec((LANES, LANES), lambda p, t: (0, 0)),
                pl.BlockSpec((tile_r, tile_r), lambda p, t: (0, 0)),
                pl.BlockSpec((tile_r, LANES), lambda p, t: (t, 0)),
                # events are only consumed in phase 1; park on block 0 in
                # phase 0 so they are not streamed twice from HBM.
                pl.BlockSpec((tile_r, LANES), lambda p, t: (p * t, 0)),
            ],
            out_specs=pl.BlockSpec((1, 1), lambda p, t: (0, 0)),
            scratch_shapes=[pltpu.VMEM((1, 1), jnp.float32)] * 4,
        ),
        compiler_params=pltpu.CompilerParams(
            dimension_semantics=("arbitrary", "arbitrary")),
    )(tri_lane, tri_row, logh_p, ev_p)
    return out[0, 0]


def _cox_ph_loss_sorted_ref(log_h, events, eps=EPS):
    events = jnp.reshape(events, (-1,)).astype(jnp.float32)
    log_h = jnp.reshape(log_h, (-1,)).astype(jnp.float32)
    gamma = jnp.max(log_h)
    log_cumsum_h = jnp.log(jnp.cumsum(jnp.exp(log_h - gamma)) + eps) + gamma
    loss = -jnp.sum((log_h - log_cumsum_h) * events)
    denom = jnp.sum(events)
    return jnp.where(denom == 0.0, loss, loss / denom)


if __name__ == "__main__":
    # CoxPHLossSorted has no parameters; inputs are log-hazards + event flags.
    key = jax.random.PRNGKey(0)
    k1, k2, k3, k4 = jax.random.split(key, 4)

    # Small case matching the module's expected usage.
    N = 8
    log_h = jax.random.normal(k1, (N, 1), dtype=jnp.float32)   # model output
    events = (jax.random.uniform(k2, (N,)) > 0.5).astype(jnp.float32)
    loss = cox_ph_loss_sorted_pallas(log_h, events)
    jax.block_until_ready(loss)
    ref = _cox_ph_loss_sorted_ref(log_h, events)
    assert jnp.allclose(loss, ref, atol=1e-5, rtol=1e-5), (loss, ref)

    # Larger case exercising multiple row-tiles, the carried prefix, the
    # two-phase gamma reduction and the padded-lane masking.
    N2 = 3000
    log_h2 = jax.random.normal(k3, (N2, 1), dtype=jnp.float32)
    events2 = (jax.random.uniform(k4, (N2,)) > 0.5).astype(jnp.float32)
    loss2 = cox_ph_loss_sorted_pallas(log_h2, events2, max_tile_rows=8)
    jax.block_until_ready(loss2)
    ref2 = _cox_ph_loss_sorted_ref(log_h2, events2)
    assert jnp.allclose(loss2, ref2, atol=1e-4, rtol=1e-4), (loss2, ref2)

    print("KERNEL_OK")
</pallas_src>

<mosaic_0001>
module attributes {stable_mosaic.version = 11 : i64} {
  func.func @_cox_ph_kernel(%arg0: i32, %arg1: i32, %arg2: memref<128x128xf32, #tpu.memory_space<vmem>>, %arg3: memref<8x8xf32, #tpu.memory_space<vmem>>, %arg4: memref<8x128xf32, #tpu.memory_space<vmem>>, %arg5: memref<8x128xf32, #tpu.memory_space<vmem>>, %arg6: memref<1x1xf32, #tpu.memory_space<vmem>>, %arg7: memref<1x1xf32, #tpu.memory_space<vmem>>, %arg8: memref<1x1xf32, #tpu.memory_space<vmem>>, %arg9: memref<1x1xf32, #tpu.memory_space<vmem>>, %arg10: memref<1x1xf32, #tpu.memory_space<vmem>>) attributes {dimension_semantics = [#tpu.dimension_semantics<arbitrary>, #tpu.dimension_semantics<arbitrary>], iteration_bounds = array<i64: 2, 1>, scalar_prefetch = 0 : i64, scratch_operands = 4 : i64, tpu.core_type = #tpu.core_type<tc>, window_params = [{pipeline_mode = #tpu.pipeline_mode<synchronous>, transform_indices = @transform_0, window_bounds = array<i64: 128, 128>}, {pipeline_mode = #tpu.pipeline_mode<synchronous>, transform_indices = @transform_1, window_bounds = array<i64: 8, 8>}, {transform_indices = @transform_2, window_bounds = array<i64: 8, 128>}, {transform_indices = @transform_3, window_bounds = array<i64: 8, 128>}, {pipeline_mode = #tpu.pipeline_mode<synchronous>, transform_indices = @transform_4, window_bounds = array<i64: 1, 1>}]} {
    %0 = tpu.iota {dimensions = array<i32: 0>} : vector<8x128xi32>
    %1 = tpu.iota {dimensions = array<i32: 1>} : vector<8x128xi32>
    %c8_i32 = arith.constant 8 : i32
    %2 = arith.muli %arg1, %c8_i32 : i32
    %3 = vector.broadcast %2 : i32 to vector<8x128xi32>
    %4 = arith.addi %3, %0 : vector<8x128xi32>
    %c128_i32 = arith.constant 128 : i32
    %5 = vector.broadcast %c128_i32 : i32 to vector<8x128xi32>
    %6 = arith.muli %4, %5 : vector<8x128xi32>
    %7 = arith.addi %6, %1 : vector<8x128xi32>
    %c8_i32_0 = arith.constant 8 : i32
    %8 = vector.broadcast %c8_i32_0 : i32 to vector<8x128xi32>
    %9 = arith.cmpi slt, %7, %8 : vector<8x128xi32>
    %c0 = arith.constant 0 : index
    %c0_1 = arith.constant 0 : index
    %10 = vector.load %arg4[%c0, %c0_1] : memref<8x128xf32, #tpu.memory_space<vmem>>, vector<8x128xf32>
    %c0_i32 = arith.constant 0 : i32
    %11 = arith.cmpi eq, %arg0, %c0_i32 : i32
    %c0_i32_2 = arith.constant 0 : i32
    %12 = arith.cmpi eq, %arg1, %c0_i32_2 : i32
    %13 = arith.andi %11, %12 : i1
    %14 = arith.extui %13 : i1 to i32
    %c0_i32_3 = arith.constant 0 : i32
    %15 = arith.cmpi ne, %14, %c0_i32_3 : i32
    scf.if %15 {
      %cst = arith.constant 0xFF800000 : f32
      %32 = vector.broadcast %cst : f32 to vector<1x1xf32>
      %c0_13 = arith.constant 0 : index
      %c0_14 = arith.constant 0 : index
      %33 = vector.load %arg7[%c0_13, %c0_14] : memref<1x1xf32, #tpu.memory_space<vmem>>, vector<1x1xf32>
      tpu.vector_store %arg7[%c0_13, %c0_14], %32 {strides = array<i32>} : memref<1x1xf32, #tpu.memory_space<vmem>>, vector<1x1xf32>,
    } else {
    }
    %c0_i32_4 = arith.constant 0 : i32
    %16 = arith.cmpi eq, %arg0, %c0_i32_4 : i32
    %17 = arith.extui %16 : i1 to i32
    %c0_i32_5 = arith.constant 0 : i32
    %18 = arith.cmpi ne, %17, %c0_i32_5 : i32
    scf.if %18 {
      %cst = arith.constant 0xFF800000 : f32
      %32 = vector.broadcast %cst : f32 to vector<8x128xf32>
      %33 = arith.select %9, %10, %32 : vector<8x128xi1>, vector<8x128xf32>
      %34 = vector.shape_cast %33 : vector<8x128xf32> to vector<1x8x128xf32>
      %cst_13 = arith.constant dense<0xFF800000> : vector<1xf32>
      %35 = vector.multi_reduction <maximumf>, %34, %cst_13 [1, 2] : vector<1x8x128xf32> to vector<1xf32>
      %36 = vector.shape_cast %35 : vector<1xf32> to vector<1x1x1xf32>
      %37 = vector.extract %36[0, 0, 0] : f32 from vector<1x1x1xf32>
      %c0_14 = arith.constant 0 : index
      %c0_15 = arith.constant 0 : index
      %38 = vector.load %arg7[%c0_14, %c0_15] : memref<1x1xf32, #tpu.memory_space<vmem>>, vector<1x1xf32>
      %39 = vector.broadcast %37 : f32 to vector<1x1xf32>
      %40 = arith.maximumf %38, %39 : vector<1x1xf32>
      %c0_16 = arith.constant 0 : index
      %c0_17 = arith.constant 0 : index
      %41 = vector.load %arg7[%c0_16, %c0_17] : memref<1x1xf32, #tpu.memory_space<vmem>>, vector<1x1xf32>
      tpu.vector_store %arg7[%c0_16, %c0_17], %40 {strides = array<i32>} : memref<1x1xf32, #tpu.memory_space<vmem>>, vector<1x1xf32>,
    } else {
    }
    %c1_i32 = arith.constant 1 : i32
    %19 = arith.cmpi eq, %arg0, %c1_i32 : i32
    %c0_i32_6 = arith.constant 0 : i32
    %20 = arith.cmpi eq, %arg1, %c0_i32_6 : i32
    %21 = arith.andi %19, %20 : i1
    %22 = arith.extui %21 : i1 to i32
    %c0_i32_7 = arith.constant 0 : i32
    %23 = arith.cmpi ne, %22, %c0_i32_7 : i32
    scf.if %23 {
      %cst = arith.constant 0.000000e+00 : f32
      %32 = vector.broadcast %cst : f32 to vector<1x1xf32>
      %c0_13 = arith.constant 0 : index
      %c0_14 = arith.constant 0 : index
      %33 = vector.load %arg8[%c0_13, %c0_14] : memref<1x1xf32, #tpu.memory_space<vmem>>, vector<1x1xf32>
      tpu.vector_store %arg8[%c0_13, %c0_14], %32 {strides = array<i32>} : memref<1x1xf32, #tpu.memory_space<vmem>>, vector<1x1xf32>,
      %cst_15 = arith.constant 0.000000e+00 : f32
      %34 = vector.broadcast %cst_15 : f32 to vector<1x1xf32>
      %c0_16 = arith.constant 0 : index
      %c0_17 = arith.constant 0 : index
      %35 = vector.load %arg9[%c0_16, %c0_17] : memref<1x1xf32, #tpu.memory_space<vmem>>, vector<1x1xf32>
      tpu.vector_store %arg9[%c0_16, %c0_17], %34 {strides = array<i32>} : memref<1x1xf32, #tpu.memory_space<vmem>>, vector<1x1xf32>,
      %cst_18 = arith.constant 0.000000e+00 : f32
      %36 = vector.broadcast %cst_18 : f32 to vector<1x1xf32>
      %c0_19 = arith.constant 0 : index
      %c0_20 = arith.constant 0 : index
      %37 = vector.load %arg10[%c0_19, %c0_20] : memref<1x1xf32, #tpu.memory_space<vmem>>, vector<1x1xf32>
      tpu.vector_store %arg10[%c0_19, %c0_20], %36 {strides = array<i32>} : memref<1x1xf32, #tpu.memory_space<vmem>>, vector<1x1xf32>,
    } else {
    }
    %c1_i32_8 = arith.constant 1 : i32
    %24 = arith.cmpi eq, %arg0, %c1_i32_8 : i32
    %25 = arith.extui %24 : i1 to i32
    %c0_i32_9 = arith.constant 0 : i32
    %26 = arith.cmpi ne, %25, %c0_i32_9 : i32
    scf.if %26 {
      %c0_13 = arith.constant 0 : index
      %c0_14 = arith.constant 0 : index
      %32 = vector.load %arg7[%c0_13, %c0_14] : memref<1x1xf32, #tpu.memory_space<vmem>>, vector<1x1xf32>
      %c0_15 = arith.constant 0 : index
      %c0_16 = arith.constant 0 : index
      %33 = vector.load %arg5[%c0_15, %c0_16] : memref<8x128xf32, #tpu.memory_space<vmem>>, vector<8x128xf32>
      %34 = vector.broadcast %32 : vector<1x1xf32> to vector<8x128xf32>
      %35 = arith.subf %10, %34 : vector<8x128xf32>
      %cst = arith.constant -1.000000e+30 : f32
      %36 = vector.broadcast %cst : f32 to vector<8x128xf32>
      %37 = arith.select %9, %35, %36 : vector<8x128xi1>, vector<8x128xf32>
      %38 = math.exp %37 : vector<8x128xf32>
      %c0_17 = arith.constant 0 : index
      %c0_18 = arith.constant 0 : index
      %39 = vector.load %arg2[%c0_17, %c0_18] : memref<128x128xf32, #tpu.memory_space<vmem>>, vector<128x128xf32>
      %cst_19 = arith.constant dense<0.000000e+00> : vector<8x128xf32>
      %40 = tpu.matmul %38, %39, %cst_19 {dimension_numbers = #tpu.dot_dimension_numbers<[1], [0], [0], [1], [0, 0, 1, 1], [], []>} : vector<8x128xf32>, vector<128x128xf32>, vector<8x128xf32> -> vector<8x128xf32>
      %41 = vector.extract_strided_slice %40 {offsets = [0, 127], sizes = [8, 1], strides = [1, 1]} : vector<8x128xf32> to vector<8x1xf32>
      %c0_20 = arith.constant 0 : index
      %c0_21 = arith.constant 0 : index
      %42 = vector.load %arg3[%c0_20, %c0_21] : memref<8x8xf32, #tpu.memory_space<vmem>>, vector<8x8xf32>
      %cst_22 = arith.constant dense<0.000000e+00> : vector<8x1xf32>
      %43 = tpu.matmul %42, %41, %cst_22 {dimension_numbers = #tpu.dot_dimension_numbers<[1], [0], [0], [1], [0, 0, 1, 1], [], []>} : vector<8x8xf32>, vector<8x1xf32>, vector<8x1xf32> -> vector<8x1xf32>
      %c0_23 = arith.constant 0 : index
      %c0_24 = arith.constant 0 : index
      %44 = vector.load %arg8[%c0_23, %c0_24] : memref<1x1xf32, #tpu.memory_space<vmem>>, vector<1x1xf32>
      %45 = vector.broadcast %44 : vector<1x1xf32> to vector<8x1xf32>
      %46 = arith.addf %45, %43 : vector<8x1xf32>
      %47 = vector.broadcast %46 : vector<8x1xf32> to vector<8x128xf32>
      %48 = arith.addf %47, %40 : vector<8x128xf32>
      %cst_25 = arith.constant 1.000000e-07 : f32
      %49 = vector.broadcast %cst_25 : f32 to vector<8x128xf32>
      %50 = arith.addf %48, %49 : vector<8x128xf32>
      %51 = math.log %50 : vector<8x128xf32>
      %52 = vector.broadcast %32 : vector<1x1xf32> to vector<8x128xf32>
      %53 = arith.addf %51, %52 : vector<8x128xf32>
      %c0_26 = arith.constant 0 : index
      %c0_27 = arith.constant 0 : index
      %54 = vector.load %arg9[%c0_26, %c0_27] : memref<1x1xf32, #tpu.memory_space<vmem>>, vector<1x1xf32>
      %55 = arith.subf %10, %53 : vector<8x128xf32>
      %56 = arith.mulf %55, %33 : vector<8x128xf32>
      %57 = vector.shape_cast %56 : vector<8x128xf32> to vector<1x8x128xf32>
      %cst_28 = arith.constant dense<0.000000e+00> : vector<1xf32>
      %58 = vector.multi_reduction <add>, %57, %cst_28 [1, 2] : vector<1x8x128xf32> to vector<1xf32>
      %59 = vector.shape_cast %58 : vector<1xf32> to vector<1x1x1xf32>
      %60 = vector.extract %59[0, 0, 0] : f32 from vector<1x1x1xf32>
      %61 = vector.broadcast %60 : f32 to vector<1x1xf32>
      %62 = arith.addf %54, %61 : vector<1x1xf32>
      %c0_29 = arith.constant 0 : index
      %c0_30 = arith.constant 0 : index
      %63 = vector.load %arg9[%c0_29, %c0_30] : memref<1x1xf32, #tpu.memory_space<vmem>>, vector<1x1xf32>
      tpu.vector_store %arg9[%c0_29, %c0_30], %62 {strides = array<i32>} : memref<1x1xf32, #tpu.memory_space<vmem>>, vector<1x1xf32>,
      %c0_31 = arith.constant 0 : index
      %c0_32 = arith.constant 0 : index
      %64 = vector.load %arg10[%c0_31, %c0_32] : memref<1x1xf32, #tpu.memory_space<vmem>>, vector<1x1xf32>
      %65 = vector.shape_cast %33 : vector<8x128xf32> to vector<1x8x128xf32>
      %cst_33 = arith.constant dense<0.000000e+00> : vector<1xf32>
      %66 = vector.multi_reduction <add>, %65, %cst_33 [1, 2] : vector<1x8x128xf32> to vector<1xf32>
      %67 = vector.shape_cast %66 : vector<1xf32> to vector<1x1x1xf32>
      %68 = vector.extract %67[0, 0, 0] : f32 from vector<1x1x1xf32>
      %69 = vector.broadcast %68 : f32 to vector<1x1xf32>
      %70 = arith.addf %64, %69 : vector<1x1xf32>
      %c0_34 = arith.constant 0 : index
      %c0_35 = arith.constant 0 : index
      %71 = vector.load %arg10[%c0_34, %c0_35] : memref<1x1xf32, #tpu.memory_space<vmem>>, vector<1x1xf32>
      tpu.vector_store %arg10[%c0_34, %c0_35], %70 {strides = array<i32>} : memref<1x1xf32, #tpu.memory_space<vmem>>, vector<1x1xf32>,
      %c0_36 = arith.constant 0 : index
      %c0_37 = arith.constant 0 : index
      %72 = vector.load %arg8[%c0_36, %c0_37] : memref<1x1xf32, #tpu.memory_space<vmem>>, vector<1x1xf32>
      %73 = vector.shape_cast %38 : vector<8x128xf32> to vector<1x8x128xf32>
      %cst_38 = arith.constant dense<0.000000e+00> : vector<1xf32>
      %74 = vector.multi_reduction <add>, %73, %cst_38 [1, 2] : vector<1x8x128xf32> to vector<1xf32>
      %75 = vector.shape_cast %74 : vector<1xf32> to vector<1x1x1xf32>
      %76 = vector.extract %75[0, 0, 0] : f32 from vector<1x1x1xf32>
      %77 = vector.broadcast %76 : f32 to vector<1x1xf32>
      %78 = arith.addf %72, %77 : vector<1x1xf32>
      %c0_39 = arith.constant 0 : index
      %c0_40 = arith.constant 0 : index
      %79 = vector.load %arg8[%c0_39, %c0_40] : memref<1x1xf32, #tpu.memory_space<vmem>>, vector<1x1xf32>
      tpu.vector_store %arg8[%c0_39, %c0_40], %78 {strides = array<i32>} : memref<1x1xf32, #tpu.memory_space<vmem>>, vector<1x1xf32>,
    } else {
    }
    %c1_i32_10 = arith.constant 1 : i32
    %27 = arith.cmpi eq, %arg0, %c1_i32_10 : i32
    %c0_i32_11 = arith.constant 0 : i32
    %28 = arith.cmpi eq, %arg1, %c0_i32_11 : i32
    %29 = arith.andi %27, %28 : i1
    %30 = arith.extui %29 : i1 to i32
    %c0_i32_12 = arith.constant 0 : i32
    %31 = arith.cmpi ne, %30, %c0_i32_12 : i32
    scf.if %31 {
      %c0_13 = arith.constant 0 : index
      %c0_14 = arith.constant 0 : index
      %32 = vector.load %arg9[%c0_13, %c0_14] : memref<1x1xf32, #tpu.memory_space<vmem>>, vector<1x1xf32>
      %cst = arith.constant 0.000000e+00 : f32
      %33 = vector.broadcast %cst : f32 to vector<1x1xf32>
      %34 = arith.subf %33, %32 : vector<1x1xf32>
      %c0_15 = arith.constant 0 : index
      %c0_16 = arith.constant 0 : index
      %35 = vector.load %arg10[%c0_15, %c0_16] : memref<1x1xf32, #tpu.memory_space<vmem>>, vector<1x1xf32>
      %cst_17 = arith.constant 0.000000e+00 : f32
      %36 = vector.broadcast %cst_17 : f32 to vector<1x1xf32>
      %37 = arith.cmpf oeq, %35, %36 : vector<1x1xf32>
      %38 = arith.divf %34, %35 : vector<1x1xf32>
      %39 = arith.select %37, %34, %38 : vector<1x1xi1>, vector<1x1xf32>
      %c0_18 = arith.constant 0 : index
      %c0_19 = arith.constant 0 : index
      %40 = vector.load %arg6[%c0_18, %c0_19] : memref<1x1xf32, #tpu.memory_space<vmem>>, vector<1x1xf32>
      tpu.vector_store %arg6[%c0_18, %c0_19], %39 {strides = array<i32>} : memref<1x1xf32, #tpu.memory_space<vmem>>, vector<1x1xf32>,
    } else {
    }
    return
  }
  func.func @transform_0(%arg0: i32, %arg1: i32) -> (i32, i32) {
    %c0_i32 = arith.constant 0 : i32
    %c0_i32_0 = arith.constant 0 : i32
    %c0_i32_1 = arith.constant 0 : i32
    return %c0_i32, %c0_i32_0 : i32, i32
  }
  func.func @transform_1(%arg0: i32, %arg1: i32) -> (i32, i32) {
    %c0_i32 = arith.constant 0 : i32
    %c0_i32_0 = arith.constant 0 : i32
    %c0_i32_1 = arith.constant 0 : i32
    return %c0_i32, %c0_i32_0 : i32, i32
  }
  func.func @transform_2(%arg0: i32, %arg1: i32) -> (i32, i32) {
    %c0_i32 = arith.constant 0 : i32
    %c0_i32_0 = arith.constant 0 : i32
    return %arg1, %c0_i32 : i32, i32
  }
  func.func @transform_3(%arg0: i32, %arg1: i32) -> (i32, i32) {
    %0 = arith.muli %arg0, %arg1 : i32
    %c0_i32 = arith.constant 0 : i32
    %c0_i32_0 = arith.constant 0 : i32
    return %0, %c0_i32 : i32, i32
  }
  func.func @transform_4(%arg0: i32, %arg1: i32) -> (i32, i32) {
    %c0_i32 = arith.constant 0 : i32
    %c0_i32_0 = arith.constant 0 : i32
    %c0_i32_1 = arith.constant 0 : i32
    return %c0_i32, %c0_i32_0 : i32, i32
  }
}

</mosaic_0001>

<bundles_post_ra>
// kernel: tpu_custom_call.1
= control target key start
LH: loop header
LB: loop body
LE: loop exit
PB: predicated region body
PF: predicated region fallthrough
CT: control target
= control target key end

     0   :  { %9 = vsyncpa [#allocation7], 0  ;;  %s1195_s0 = inlined_call_operand.hbm [shape: f32[128,128], index: 0, kind: input, shape index: {}]   ;;  %s1196_s1 = inlined_call_operand.hbm [shape: f32[8,8], index: 1, kind: input, shape index: {}]   ;;  %s1197_s2 = inlined_call_operand.hbm [shape: f32[8,128], index: 2, kind: input, shape index: {}]   ;;  %s1198_s3 = inlined_call_operand.vmem [shape: f32[8,128], index: 3, kind: input, shape index: {}]   ;;  %s1199_s4 = inlined_call_operand.hbm [shape: f32[1,1], index: 4, kind: output, shape index: {}]  }
   0x1   :  { %10 = vsyncpa [#allocation10], 0 }
   0x2   :  { %11 = vsyncpa [#allocation8], 0  ;;  %s1013_s15 = smov 0   ;;  %s1015_s16 = smov 0  }
   0x3   :  { %s1017_s17 = smov 0  }
   0x4 LB: > { %s975_s18 = smov [#allocation9]   ;;  %s635_s20 = sadd.s32 4294967295, %s973_s17   ;;  %s973_s17 = sphi %s1017_s17, %s17_s17   ;;  %s969_s16 = sphi %s1015_s16, %s1213_s16   ;;  %s965_s15 = sphi %s1013_s15, %s1212_s15  }
   0x5   : > { %s177_s19 = sshll.u32 %s975_s18, 4  ;;  %p636_p0 = scmp.ge.s32.totalorder %s973_s17, 1  ;;  %s178_s19 = int_to_ptr.vmem [resolvable:$true] %s177_s19 }
   0x6   : > { %p151_p1 = scmp.lt.s32.totalorder %s973_s17, 3  ;;  %p1033_p2 = scmp.eq.s32.totalorder %s635_s20, 0 }
   0x7   : > { %s29_s23 = sadd.s32 1, %s969_s16  ;;  %s976_s26 = smov [#allocation6]  }
   0x8   : > { %s1203_s21 = scalar_select %p1033_p2, 1, 0 }
   0x9   : > { %p1037_p3 = pnand %p636_p0, %p151_p1  ;;  %p1050_p6 = scmp.ge.s32.totalorder %s29_s23, 2 }
   0xa   : > { %s163_s27 = sshll.u32 %s976_s26, 4  ;;  %s829_s30 = scalar_lea.hbm %s1196_s1, 128  ;;  %s1054_s27 = int_to_ptr.vmem [resolvable:$true] %s163_s27 }
   0xb   : > { %s1204_s22 = scalar_select %p1037_p3, 1, 0 }
   0xc   : > { %p766_p4 = pneg %p1037_p3  ;;  %p830_p7 = scmp.ne.s32.totalorder %s1196_s1, %s829_s30 }
   0xd   : > { %s1206_s25 = scalar_select %p1050_p6, 1, 0 }
   0xe   : > { %p1046_p5 = pnand %p1033_p2, %p766_p4  ;;  %p836_p11 = scmp.lt.u32.totalorder %s829_s30, %s1196_s1 }
  0x10   : > { %p1064_p8 = pneg %p1046_p5 }
  0x12   : > { %p832_p9 = pnand %p1064_p8, %p830_p7 }
  0x14   : > { %p833_p10 = pneg %p832_p9 }
  0x16   : > { %p838_p12 = pnand %p836_p11, %p833_p10 }
  0x18   : > { %841 = shalt.err (!%p838_p12)
}
  0x19   : > { %s842_s10 = scalar_lea.vmem %s178_s19, 128  ;;  %p850_p4 = scmp.lt.s32.totalorder %s178_s19, %s178_s19 }
  0x1a   : > { %p843_p13 = scmp.ne.s32.totalorder %s178_s19, %s842_s10  ;;  %p851_p2 = scmp.lt.s32.totalorder %s842_s10, %s842_s10 }
  0x1c   : > { %p845_p0 = pnand %p843_p13, %p1064_p8  ;;  %p852_p3 = por %p851_p2, %p850_p4 }
  0x1e   : > { %p846_p1 = pneg %p845_p0 }
  0x20   : > { %p853_p6 = pnand %p852_p3, %p846_p1 }
  0x22   : > { %856 = shalt.err (!%p853_p6)
}
  0x23   : > { %772 = dma.hbm_to_vmem [thread:$0]  (!%p1046_p5), %s1196_s1, 128, %s178_s19, [#allocation10]  }
  0x24   : > { %p1208_p7 = scmp.ne.s32.totalorder %s1206_s25, 0  ;;  %s857_s18 = scalar_lea.hbm %s1195_s0, 2048 }
  0x25   : > { %p858_p2 = scmp.ne.s32.totalorder %s1195_s0, %s857_s18  ;;  %p864_p9 = scmp.lt.u32.totalorder %s857_s18, %s1195_s0 }
  0x26   : > { %s1215_s23 = smov (%p1208_p7, %s29_s23), 0 }
  0x27   : > { %p860_p3 = pnand %p858_p2, %p1064_p8 }
  0x29   : > { %p861_p6 = pneg %p860_p3 }
  0x2b   : > { %p866_p10 = pnand %p864_p9, %p861_p6 }
  0x2d   : > { %869 = shalt.err (!%p866_p10)
}
  0x2e   : > { %s870_s19 = scalar_lea.vmem %s1054_s27, 2048  ;;  %p878_p0 = scmp.lt.s32.totalorder %s1054_s27, %s1054_s27 }
  0x2f   : > { %p871_p11 = scmp.ne.s32.totalorder %s1054_s27, %s870_s19  ;;  %p879_p1 = scmp.lt.s32.totalorder %s870_s19, %s870_s19 }
  0x31   : > { %p873_p12 = pnand %p871_p11, %p1064_p8  ;;  %p880_p4 = por %p879_p1, %p878_p0 }
  0x33   : > { %p874_p13 = pneg %p873_p12 }
  0x35   : > { %p881_p7 = pnand %p880_p4, %p874_p13 }
  0x37   : > { %884 = shalt.err (!%p881_p7)
}
  0x38   : > { %s977_s25 = smov 128   ;;  %s978_s5 = smov 8  }
  0x39   : > { %769 = dma.hbm_to_vmem [thread:$0]  (!%p1046_p5), %s1195_s0, 2048, %s1054_s27, [#allocation7], %s977_s25, %s977_s25, %s978_s5  }
  0x3a   : > { %s979_s9 = smov [#allocation11]   ;;  %s885_s13 = scalar_lea.hbm %s1197_s2, 128 }
  0x3b   : > { %s190_s10 = sshll.u32 %s979_s9, 4  ;;  %p886_p2 = scmp.ne.s32.totalorder %s1197_s2, %s885_s13  ;;  %s191_s10 = int_to_ptr.vmem [resolvable:$true] %s190_s10 }
  0x3c   : > { %p892_p9 = scmp.lt.u32.totalorder %s885_s13, %s1197_s2 }
  0x3d   : > { %p888_p3 = pnand %p886_p2, %p1064_p8 }
  0x3f   : > { %p889_p6 = pneg %p888_p3 }
  0x41   : > { %p894_p10 = pnand %p892_p9, %p889_p6 }
  0x43   : > { %897 = shalt.err (!%p894_p10)
}
  0x44   : > { %s898_s27 = scalar_lea.vmem %s191_s10, 128  ;;  %p906_p0 = scmp.lt.s32.totalorder %s191_s10, %s191_s10 }
  0x45   : > { %p899_p11 = scmp.ne.s32.totalorder %s191_s10, %s898_s27  ;;  %p907_p1 = scmp.lt.s32.totalorder %s898_s27, %s898_s27 }
  0x47   : > { %p901_p12 = pnand %p899_p11, %p1064_p8  ;;  %p908_p4 = por %p907_p1, %p906_p0 }
  0x49   : > { %p902_p13 = pneg %p901_p12 }
  0x4b   : > { %p909_p7 = pnand %p908_p4, %p902_p13 }
  0x4d   : > { %912 = shalt.err (!%p909_p7)
}
  0x4e   : > { %775 = dma.hbm_to_vmem [thread:$0]  (!%p1046_p5), %s1197_s2, 128, %s191_s10, [#allocation10]  }
  0x4f   : > { %p1209_p2 = scmp.ne.s32.totalorder %s1204_s22, 0 }
  0x50   : > { %p1210_p3 = scmp.ne.s32.totalorder (!%p1209_p2), %s1203_s21, 0 }
  0x51   : > { %212 = sbr.rel (%p1209_p2) target bundleno = 1415 (0x587), region = 36 }
  0x58   : > { %952 = dma.done.wait (%p1210_p3), [#allocation7], 2048  }
  0x59   : > { %954 = vsyncadd (%p1210_p3), [#allocation7], 4294965248 }
  0x5a   : > { %956 = dma.done.wait (%p1210_p3), [#allocation10], 256  }
  0x5b   : > { %958 = vsyncadd (%p1210_p3), [#allocation10], 4294967040  ;;  %v247_v0 = vlaneseq  ;;  %p258_p8 = scmp.eq.s32.totalorder %s965_s15, 0  ;;  %v1138_v5 = vld [vmem:[#allocation11] sm:$0xff] }
  0x5c   : > { %vm264_vm1 = vcmask (%p258_p8), 0   ;;  %v980_v6 = vmov (%p258_p8), -inf  }
  0x5d   : > { %v248_v1 = vshrl.u32 %v247_v0, 7  ;;  %v250_v2 = vand.u32 127, %v247_v0  ;;  %263 = sbr.rel (!%p258_p8) target bundleno = 100 (0x64), region = 52  ;;  %265 = vst.msk [vmem:[#allocation2] sm:$0x1] (%p258_p8), %vm264_vm1, %v980_v6 }
  0x5f   : > { %v254_v3 = vmul.u32 128, %v248_v1 }
  0x61   : > { %v1136_v4 = vadd.s32 %v254_v3, %v250_v2 }
  0x63   : > { %vm256_vm0 = vcmp.lt.s32.totalorder %v1136_v4, 8 }
  0x64 PF: > { %p647_p5 = scmp.ne.s32.totalorder %s965_s15, 0 }
  0x65   : > { %v269_v7 = vsel (!%p647_p5), %vm256_vm0, %v1138_v5, -inf  ;;  %v279_v15 = vld [vmem:[#allocation2] sm:$0x1] (!%p647_p5)  ;;  %vm282_vm2 = vcmask (!%p647_p5), 0  }
  0x66   : > { %268 = sbr.rel (%p647_p5) target bundleno = 310 (0x136), region = 56  ;;  %270 = vmax.xlane.f32.xlu0 (!%p647_p5), %v269_v7 }
  0xf3   : > { %v271_v8 = vpop.xlane.xlu0 %270 }
  0xf4   : > { %v272_v9 = vrot.slane %v271_v8, 4 }
  0xf6   : > { %v273_v10 = vmax.f32 %v271_v8, %v272_v9 }
  0xf8   : > { %v274_v11 = vrot.slane %v273_v10, 2 }
  0xfa   : > { %v275_v12 = vmax.f32 %v273_v10, %v274_v11 }
  0xfc   : > { %v276_v13 = vrot.slane %v275_v12, 1 }
  0xfe   : > { %v277_v14 = vmax.f32 %v275_v12, %v276_v13 }
 0x100   : > { %742 = vpush %v277_v14 }
 0x131   : > { %s743_s21 = spop %742 }
 0x132   : > { %v280_v16 = vstv %s743_s21 }
 0x133   : > { %v281_v17 = vmax.f32 %v279_v15, %v280_v16 }
 0x135   : > { %283 = vst.msk [vmem:[#allocation2] sm:$0x1] %vm282_vm2, %v281_v17 }
 0x136 PF: > { %p284_p6 = scmp.eq.s32.totalorder %s965_s15, 1 }
 0x137   : > { %vm289_vm3 = vcmask (%p284_p6), 0   ;;  %v981_v18 = vmov (%p284_p6), 0.0  }
 0x138   : > { %288 = sbr.rel (!%p284_p6) target bundleno = 319 (0x13f), region = 60  ;;  %290 = vst.msk [vmem:[#allocation3] sm:$0x1] (%p284_p6), %vm289_vm3, %v981_v18  ;;  %291 = vst.msk [vmem:[#allocation4] sm:$0x1] (%p284_p6), %vm289_vm3, %v981_v18 }
 0x139   : > { %292 = vst.msk [vmem:[#allocation5] sm:$0x1] (%p284_p6), %vm289_vm3, %v981_v18 }
 0x13f PF: > { %p649_p9 = scmp.ne.s32.totalorder %s965_s15, 1 }
 0x140   : > { %v650_v19 = vld [vmem:[#allocation2] ss:$0 sm:$0xff] (!%p649_p9)  ;;  %v311_v20 = vld [vmem:[#allocation6] sm:$0xff] (!%p649_p9)  ;;  %v312_v21 = vld [vmem:[#allocation6 + $0x8] sm:$0xff] (!%p649_p9)  ;;  %v982_v22 = vmov (!%p649_p9), 0   ;;  %v983_v23 = vmov (!%p649_p9), 0.0|0.0  }
 0x141   : > { %295 = sbr.rel (%p649_p9) target bundleno = 1369 (0x559), region = 64  ;;  %821 = vset.pattern.permute.xlu0 (!%p649_p9), %v982_v22  ;;  %718 = vmatprep.subr.bf16.mxu0 (!%p649_p9), %v983_v23  ;;  %v719_v24 = vpack.c.bf16 (!%p649_p9), %v312_v21, %v311_v20  ;;  %v313_v25 = vld [vmem:[#allocation6 + $0x10] sm:$0xff] (!%p649_p9)  ;;  %v314_v26 = vld [vmem:[#allocation6 + $0x18] sm:$0xff] (!%p649_p9)  ;;  %v315_v28 = vld [vmem:[#allocation6 + $0x20] sm:$0xff] (!%p649_p9)  ;;  %vm984_vm4 = vmmov (!%p649_p9), 0   ;;  %v985_v33 = vmov (!%p649_p9), 0.0  }
 0x142   : > { %304 = vperm.xlu0 (!%p649_p9), %821, %v650_v19   ;;  %822 = vset.pattern.permute.xlu1 (!%p649_p9), %v982_v22  ;;  %v722_v27 = vpack.c.bf16 (!%p649_p9), %v314_v26, %v313_v25  ;;  %v316_v29 = vld [vmem:[#allocation6 + $0x28] sm:$0xff] (!%p649_p9)  ;;  %v317_v31 = vld [vmem:[#allocation6 + $0x30] sm:$0xff] (!%p649_p9)  ;;  %v318_v32 = vld [vmem:[#allocation6 + $0x38] sm:$0xff] (!%p649_p9)  ;;  %s986_s22 = smov (!%p649_p9), 1   ;;  %vm402_vm5 = vcmask (!%p649_p9), 64512   ;;  %vm508_vm6 = vcmask (!%p649_p9), 0  }
 0x143   : > { %720 = vmatpush3.bf16.msra.mxu0 (!%p649_p9), %v719_v24  ;;  %v725_v30 = vpack.c.bf16 (!%p649_p9), %v316_v29, %v315_v28  ;;  %710 = vmatprep.mubr.msk.f32.mxu0 (!%p649_p9), %vm984_vm4, %v985_v33  ;;  %v728_v34 = vpack.c.bf16 (!%p649_p9), %v318_v32, %v317_v31  ;;  %v319_v35 = vld [vmem:[#allocation6 + $0x40] sm:$0xff] (!%p649_p9)  ;;  %v320_v36 = vld [vmem:[#allocation6 + $0x48] sm:$0xff] (!%p649_p9)  ;;  %v321_v38 = vld [vmem:[#allocation6 + $0x50] sm:$0xff] (!%p649_p9) }
 0x144   : > { %721 = vmatprep.subr.bf16.mxu0 (!%p649_p9), %v983_v23  ;;  %713 = vmatprep.subr.mxu1 (!%p649_p9), %v985_v33  ;;  %v731_v37 = vpack.c.bf16 (!%p649_p9), %v320_v36, %v319_v35  ;;  %v322_v39 = vld [vmem:[#allocation6 + $0x58] sm:$0xff] (!%p649_p9)  ;;  %v323_v41 = vld [vmem:[#allocation6 + $0x60] sm:$0xff] (!%p649_p9)  ;;  %v324_v42 = vld [vmem:[#allocation6 + $0x68] sm:$0xff] (!%p649_p9) }
 0x145   : > { %715 = vmatprep.mubr.msk.f32.mxu1 (!%p649_p9), %vm984_vm4, %v985_v33  ;;  %v734_v40 = vpack.c.bf16 (!%p649_p9), %v322_v39, %v321_v38  ;;  %v737_v43 = vpack.c.bf16 (!%p649_p9), %v324_v42, %v323_v41  ;;  %v325_v44 = vld [vmem:[#allocation6 + $0x70] sm:$0xff] (!%p649_p9)  ;;  %v326_v45 = vld [vmem:[#allocation6 + $0x78] sm:$0xff] (!%p649_p9)  ;;  %v397_v55 = vld [vmem:[#allocation9] sm:$0xff] (!%p649_p9) }
 0x146   : > { %v740_v46 = vpack.c.bf16 (!%p649_p9), %v326_v45, %v325_v44  ;;  %v297_v54 = vld [vmem:[%s1198_s3] sm:$0xff] (!%p649_p9) }
 0x147   : > { %723 = vmatpush3.bf16.msra.mxu0 (!%p649_p9), %v722_v27  ;;  %v652_v57 = vld [vmem:[#allocation3] ss:$0 sm:$0xff] (!%p649_p9)  ;;  %v494_v26 = vld [vmem:[#allocation4] sm:$0x1] (!%p649_p9)  ;;  %v510_v27 = vld [vmem:[#allocation5] sm:$0x1] (!%p649_p9) }
 0x148   : > { %724 = vmatprep.subr.bf16.mxu0 %v983_v23  ;;  %v523_v29 = vld [vmem:[#allocation3] sm:$0x1] }
 0x14b   : > { %726 = vmatpush3.bf16.msra.mxu0 %v725_v30 }
 0x14c   : > { %727 = vmatprep.subr.bf16.mxu0 %v983_v23 }
 0x14f   : > { %729 = vmatpush3.bf16.msra.mxu0 %v728_v34 }
 0x150   : > { %730 = vmatprep.subr.bf16.mxu0 %v983_v23 }
 0x153   : > { %732 = vmatpush3.bf16.msra.mxu0 %v731_v37 }
 0x154   : > { %733 = vmatprep.subr.bf16.mxu0 %v983_v23 }
 0x157   : > { %735 = vmatpush3.bf16.msra.mxu0 %v734_v40 }
 0x158   : > { %736 = vmatprep.subr.bf16.mxu0 %v983_v23 }
 0x15b   : > { %738 = vmatpush3.bf16.msra.mxu0 %v737_v43 }
 0x15c   : > { %739 = vmatprep.subr.bf16.mxu0 %v983_v23 }
 0x15f   : > { %741 = vmatpush3.bf16.msra.mxu0 %v740_v46 }
 0x1c1   : > { %v305_v47 = vpop.permute.xlu0 %304 }
 0x1c2   : > { %v307_v48 = vsub.f32 %v1138_v5, %v305_v47 }
 0x1c4   : > { %v308_v49 = vsel %vm256_vm0, %v307_v48, -1e+30 }
 0x1c5   : > { %v309_v50 = vmul.f32 1.442695, %v308_v49 }
 0x1c7   : > { %823 = vpow2.f32 %v309_v50 }
 0x1d1   : > { %v824_v51 = vpop.eup %823 }
 0x1d2   : > { %711 = vmatmul.mubr.f32.vlgmr.msra.gmra.mrb[0].mxu0 %v824_v51 }
 0x2a5   : > { %v393_v52 = vpop.f32.mrb[0].mxu0 }
 0x2a6   : > { %399 = vrot.lane.b32.xlu0 %v393_v52, %s986_s22  ;;  %v712_v53 = vpop.f32.mrb[1].mxu0 }
 0x2c5   : > { %511 = vadd.xlane.f32.xlu0 %v297_v54 }
 0x2c9   : > { %524 = vadd.xlane.f32.xlu0 %v824_v51 }
 0x318   : > { %v400_v56 = vpop.permute.xlu0 %399 }
 0x319   : > { %714 = vmatpush3.msra.mxu1 %v400_v56 }
 0x31a   : > { %716 = vmatmul.mubr.msk.f32.vlgmr.msra.gmra.mrb[0].mxu1 %vm402_vm5, %v397_v55 }
 0x352   : > { %v512_v6 = vpop.xlane.xlu0 %511 }
 0x353   : > { %v513_v8 = vrot.slane %v512_v6, 4 }
 0x355   : > { %v514_v10 = vadd.f32 %v513_v8, %v512_v6 }
 0x356   : > { %v525_v7 = vpop.xlane.xlu0 %524 }
 0x357   : > { %v526_v9 = vrot.slane %v525_v7, 4  ;;  %v515_v12 = vrot.slane %v514_v10, 2 }
 0x359   : > { %v527_v11 = vadd.f32 %v526_v9, %v525_v7  ;;  %v516_v17 = vadd.f32 %v515_v12, %v514_v10 }
 0x35b   : > { %v528_v14 = vrot.slane %v527_v11, 2  ;;  %v517_v21 = vrot.slane %v516_v17, 1 }
 0x35d   : > { %v529_v18 = vadd.f32 %v528_v14, %v527_v11  ;;  %v518_v24 = vadd.f32 %v517_v21, %v516_v17 }
 0x3ed   : > { %v472_v58 = vpop.f32.mrb[0].mxu1 }
 0x3ee   : > { %v483_v59 = vadd.f32 %v652_v57, %v472_v58  ;;  %v717_v60 = vpop.f32.mrb[1].mxu1 }
 0x3f0   : > { %486 = vperm.xlu1 %822, %v483_v59  }
 0x46f   : > { %v487_v61 = vpop.permute.xlu1 %486 }
 0x470   : > { %v489_v62 = vadd.f32 %v487_v61, %v393_v52 }
 0x472   : > { %v490_v63 = vadd.f32 1e-07, %v489_v62 }
 0x474   : > { %825 = vlog2.f32 %v490_v63 }
 0x47e   : > { %v826_v0 = vpop.eup %825 }
 0x47f   : > { %v492_v1 = vmul.f32 0.6931472, %v826_v0 }
 0x481   : > { %v493_v2 = vadd.f32 %v492_v1, %v305_v47 }
 0x483   : > { %v495_v3 = vsub.f32 %v1138_v5, %v493_v2  ;;  %v530_v5 = vrot.slane %v529_v18, 1 }
 0x485   : > { %v496_v4 = vmul.f32 %v495_v3, %v297_v54  ;;  %v531_v25 = vadd.f32 %v530_v5, %v529_v18 }
 0x487   : > { %497 = vadd.xlane.f32.xlu1 %v496_v4 }
 0x514   : > { %v498_v13 = vpop.xlane.xlu1 %497 }
 0x515   : > { %v499_v15 = vrot.slane %v498_v13, 4 }
 0x517   : > { %v500_v16 = vadd.f32 %v499_v15, %v498_v13 }
 0x519   : > { %v501_v19 = vrot.slane %v500_v16, 2 }
 0x51b   : > { %v502_v20 = vadd.f32 %v501_v19, %v500_v16 }
 0x51d   : > { %v503_v22 = vrot.slane %v502_v20, 1 }
 0x51f   : > { %v504_v23 = vadd.f32 %v503_v22, %v502_v20 }
 0x521   : > { %744 = vpush %v504_v23 }
 0x522   : > { %746 = vpush %v518_v24 }
 0x523   : > { %748 = vpush %v531_v25 }
 0x552   : > { %s745_s19 = spop %744 }
 0x553   : > { %v506_v28 = vstv %s745_s19  ;;  %s747_s25 = spop %746 }
 0x554   : > { %v507_v30 = vadd.f32 %v506_v28, %v494_v26  ;;  %v520_v31 = vstv %s747_s25  ;;  %s749_s5 = spop %748 }
 0x555   : > { %v521_v32 = vadd.f32 %v520_v31, %v510_v27  ;;  %v533_v33 = vstv %s749_s5 }
 0x556   : > { %509 = vst.msk [vmem:[#allocation4] sm:$0x1] %vm508_vm6, %v507_v30  ;;  %v534_v34 = vadd.f32 %v533_v33, %v523_v29 }
 0x557   : > { %522 = vst.msk [vmem:[#allocation5] sm:$0x1] %vm508_vm6, %v521_v32 }
 0x558   : > { %535 = vst.msk [vmem:[#allocation3] sm:$0x1] %vm508_vm6, %v534_v34 }
 0x559 PF: > { %537 = sbr.rel (!%p284_p6) target bundleno = 1390 (0x56e), region = 68  ;;  %vm545_vm8 = vcmask (%p284_p6), 0  }
 0x55d   : > { %v538_v36 = vld [vmem:[#allocation4] sm:$0x1] (%p284_p6) }
 0x55e   : > { %v540_v35 = vld [vmem:[#allocation5] sm:$0x1] (%p284_p6)  ;;  %v539_v37 = vsub.f32 (%p284_p6), 0.0, %v538_v36 }
 0x55f   : > { %827 = vrcp.f32 (%p284_p6), %v540_v35  ;;  %vm541_vm7 = vcmp.eq.f32.partialorder (%p284_p6), %v540_v35, 0.0 }
 0x569   : > { %v828_v38 = vpop.eup %827 }
 0x56a   : > { %v543_v39 = vmul.f32 %v828_v38, %v539_v37 }
 0x56c   : > { %v544_v40 = vsel %vm541_vm7, %v539_v37, %v543_v39 }
 0x56d   : > { %546 = vst.msk [vmem:[#allocation12] sm:$0x1] %vm545_vm8, %v544_v40 }
 0x56e PF: > { %p1160_p10 = scmp.eq.s32.totalorder %s635_s20, 1  ;;  %s987_s15 = smov [#allocation12]  }
 0x56f   : > { %s554_s8 = sshll.u32 %s987_s15, 4  ;;  %s555_s8 = int_to_ptr.vmem [resolvable:$true] %s554_s8 }
 0x570   : > { %s913_s9 = scalar_lea.vmem %s555_s8, 16  ;;  %s919_s10 = scalar_lea.vmem %s555_s8, 32 }
 0x571   : > { %p914_p11 = scmp.ne.s32.totalorder %s555_s8, %s913_s9  ;;  %p920_p0 = scmp.lt.s32.totalorder %s555_s8, %s555_s8 }
 0x572   : > { %p921_p1 = scmp.lt.s32.totalorder %s919_s10, %s913_s9 }
 0x573   : > { %p915_p12 = pnand %p914_p11, %p1160_p10 }
 0x574   : > { %p922_p4 = por %p921_p1, %p920_p0 }
 0x575   : > { %p916_p13 = pneg %p915_p12 }
 0x577   : > { %p923_p7 = pnand %p922_p4, %p916_p13 }
 0x579   : > { %926 = shalt.err (!%p923_p7)
}
 0x57a   : > { %s927_s12 = scalar_lea.hbm %s1199_s4, 16 }
 0x57b   : > { %p928_p2 = scmp.ne.s32.totalorder %s1199_s4, %s927_s12  ;;  %p933_p5 = scmp.lt.u32.totalorder %s927_s12, %s1199_s4 }
 0x57d   : > { %p929_p3 = pnand %p928_p2, %p1160_p10 }
 0x57f   : > { %p930_p8 = pneg %p929_p3 }
 0x581   : > { %p935_p6 = pnand %p933_p5, %p930_p8 }
 0x583   : > { %938 = shalt.err (!%p935_p6)
}
 0x584   : > { %763 = dma.vmem_to_hbm [thread:$0]  (%p1160_p10), %s555_s8, 16, %s1199_s4, [#allocation8]  }
 0x585   : > { %960 = dma.done.wait (%p1160_p10), [#allocation8], 16  }
 0x586   : > { %962 = vsyncadd (%p1160_p10), [#allocation8], 4294967280 }
 0x587 PF: > { %s17_s17 = sadd.s32 1, %s973_s17   ;;  %s1212_s15 = smov %s969_s16 }
 0x588   : > { %p14_p9 = scmp.ge.s32.totalorder %s17_s17, 4   ;;  %s1213_s16 = smov %s1215_s23 }
 0x58a   :  { %16 = sbr.rel (!%p14_p9) target bundleno = 4 (0x4), region = 97 }
 0x591   :  { %567 = vsyncpa [#allocation7], 1 }
 0x592   :  { %569 = vsyncpa [#allocation7 + $0x1], 1 }
 0x593   :  { %570 = vsyncpa [#allocation10], 1 }
 0x594   :  { %571 = vsyncpa [#allocation8], 1 }
 0x595   :  { %573 = vsyncpa [#allocation8 + $0x1], 1 }

</bundles_post_ra>
